<compile_context>
chip_gen: v7x
topology: tpu7x:2x2x1
jax: 0.10.0
libtpu: 0.0.40
codegen_flags: <defaults>
</compile_context>

<pallas_src>
import functools

import jax
import jax.numpy as jnp
import numpy as np
from jax.experimental import pallas as pl
from jax.experimental.pallas import tpu as pltpu

BLK = 128                      # base tile (vreg / MXU friendly)
WH_RESIDENT_CAP = 10 << 20     # keep Wh resident if one copy <= 10 MiB (2x buffered)


# ----------------------------------------------------------------------------
# Kernel 1: projection  Wh = h @ W, plus fused attention projections (Wh1, Wh2).
# ----------------------------------------------------------------------------
def _project_kernel(h_ref, w_ref, a1_ref, a2_ref, wh_ref, wh12_ref):
    # (TQ, INP) @ (INP, OUTP) on the MXU, f32 accumulate.
    wh = jnp.dot(h_ref[...], w_ref[...], preferred_element_type=jnp.float32)
    wh_ref[...] = wh
    # Fused attention projections: VPU multiply + lane reduce on the resident
    # Wh tile instead of two 1-lane-wide MXU matmuls. Both land in one (TQ, 2)
    # output block (single small DMA per step).
    wh12_ref[:, 0:1] = jnp.sum(wh * a1_ref[...], axis=-1, keepdims=True)
    wh12_ref[:, 1:2] = jnp.sum(wh * a2_ref[...], axis=-1, keepdims=True)


# ----------------------------------------------------------------------------
# Kernel 2: masked attention with online softmax + att @ Wh accumulation.
# ----------------------------------------------------------------------------
def _attn_kernel(wh1_ref, wh2r_ref, whk_ref, adj_ref, out_ref,
                 m_sc, l_sc, *, alpha, concat, tk, wh_resident):
    ki = pl.program_id(1)

    @pl.when(ki == 0)
    def _():
        m_sc[...] = jnp.full(m_sc.shape, -jnp.inf, dtype=m_sc.dtype)
        l_sc[...] = jnp.zeros(l_sc.shape, dtype=l_sc.dtype)
        out_ref[...] = jnp.zeros(out_ref.shape, dtype=out_ref.dtype)

    # e[i, j] = leaky_relu(Wh1[i] + Wh2[j]); wh2r is lane-major (1, TK), so this
    # is a pure VPU broadcast add (no runtime transpose in the hot loop).
    e = wh1_ref[...] + wh2r_ref[...]                       # (TQ, TK)
    e = jnp.where(e > 0, e, alpha * e)                     # LeakyReLU
    # Adjacency mask (adj streamed as int8): matches torch's -9e15 fill.
    e = jnp.where(adj_ref[...] > 0, e, jnp.float32(-9.0e15))

    # Online (flash-style) softmax update; accumulate directly into out_ref
    # (f32, resident across ki since its index_map ignores ki).
    m_prev = m_sc[...]
    m_new = jnp.maximum(m_prev, jnp.max(e, axis=-1, keepdims=True))
    corr = jnp.exp(m_prev - m_new)
    p = jnp.exp(e - m_new)                                 # (TQ, TK), f32
    l_sc[...] = corr * l_sc[...] + jnp.sum(p, axis=-1, keepdims=True)

    if wh_resident:
        # Wh lives in VMEM as one (NP, OUTP) block; slice the key slab here.
        start = pl.multiple_of(ki * tk, tk)
        whk = whk_ref[pl.ds(start, tk), :]
    else:
        whk = whk_ref[...]

    out_ref[...] = corr * out_ref[...] + jnp.dot(
        p, whk, preferred_element_type=jnp.float32)
    m_sc[...] = m_new

    @pl.when(ki == pl.num_programs(1) - 1)
    def _():
        # Exact reciprocal: once per row block, outside the hot loop.
        out = out_ref[...] * pl.reciprocal(l_sc[...], approx=False)
        if concat:
            out = jnp.maximum(out, 0.0)
        out_ref[...] = out


# ----------------------------------------------------------------------------
# Wrapper
# ----------------------------------------------------------------------------
def _round_up(x, m):
    return ((x + m - 1) // m) * m


def preprocess_adjacency(adj, n_pad):
    """(adj > 0) as int8, padded to (n_pad, n_pad).

    Hoist this out and reuse the result when the same adjacency is consumed by
    multiple GAT layers / heads (it is a full N^2 read + write per call).
    """
    n = adj.shape[0]
    return jnp.pad((adj > 0).astype(jnp.int8), ((0, n_pad - n), (0, n_pad - n)))


def graph_attention_layer(h, adj, W, a, *, alpha, concat=True, adj_int8=None):
    """Pallas TPU implementation of GraphAttentionLayer.forward (eval mode)."""
    N, in_size = h.shape
    out_size = W.shape[1]

    # Pad to multiples of 128: lane-dense loads/stores, full-width MXU operands.
    NP = _round_up(N, BLK)
    INP = _round_up(in_size, BLK)
    OUTP = _round_up(out_size, BLK)

    # Tile sizes for kernel 2.  TQ stays 128 (keeps NP//TQ >= 2 for v7x's two
    # TensorCores); TK is the largest of {512, 256, 128} that divides NP so the
    # per-grid-step overhead is amortized over a bigger adj/e tile.
    TQ = BLK
    TK = next(c for c in (512, 256, 128) if NP % c == 0)

    f32 = jnp.float32
    h_p = jnp.pad(h.astype(f32), ((0, NP - N), (0, INP - in_size)))
    W_p = jnp.pad(W.astype(f32), ((0, INP - in_size), (0, OUTP - out_size)))
    a1_p = jnp.pad(a[:out_size, 0].astype(f32), (0, OUTP - out_size)).reshape(1, OUTP)
    a2_p = jnp.pad(a[out_size:, 0].astype(f32), (0, OUTP - out_size)).reshape(1, OUTP)
    # int8 adjacency: 4x less HBM traffic on the dominant N^2 stream.
    adj_p = adj_int8 if adj_int8 is not None else preprocess_adjacency(adj, NP)

    # ---- Kernel 1: projection -------------------------------------------------
    wh, wh12 = pl.pallas_call(
        _project_kernel,
        grid=(NP // BLK,),
        in_specs=[
            pl.BlockSpec((BLK, INP), lambda i: (i, 0)),
            pl.BlockSpec((INP, OUTP), lambda i: (0, 0)),   # resident across steps
            pl.BlockSpec((1, OUTP), lambda i: (0, 0)),
            pl.BlockSpec((1, OUTP), lambda i: (0, 0)),
        ],
        out_specs=[
            pl.BlockSpec((BLK, OUTP), lambda i: (i, 0)),   # lane-dense Wh
            pl.BlockSpec((BLK, 2), lambda i: (i, 0)),      # fused (Wh1, Wh2)
        ],
        out_shape=[
            jax.ShapeDtypeStruct((NP, OUTP), f32),
            jax.ShapeDtypeStruct((NP, 2), f32),
        ],
        compiler_params=pltpu.CompilerParams(
            dimension_semantics=("parallel",),
            vmem_limit_bytes=32 * 1024 * 1024,
        ),
    )(h_p, W_p, a1_p, a2_p)

    # Tiny layout plumbing in the wrapper (not in the kernel hot loop):
    wh1 = wh12[:, 0:1]                # (NP, 1) column of row-scores
    wh2_row = wh12[:, 1].reshape(1, NP)  # lane-major (1, NP) row of col-scores

    # ---- Kernel 2: tiled masked attention + aggregation ------------------------
    # Keep the full Wh key matrix resident in VMEM when it fits (one fetch per
    # kernel instead of one per row block); fall back to streaming otherwise.
    wh_bytes = NP * OUTP * 4
    wh_resident = wh_bytes <= WH_RESIDENT_CAP
    if wh_resident:
        wh_spec = pl.BlockSpec((NP, OUTP), lambda qi, ki: (0, 0))
        wh_in_bytes = 2 * wh_bytes          # default double-buffering
    else:
        wh_spec = pl.BlockSpec((TK, OUTP), lambda qi, ki: (ki, 0))
        wh_in_bytes = 2 * TK * OUTP * 4

    # Derive the VMEM limit from the actual footprint; cap at 48 MiB so the
    # resident-Wh configuration stays safe on v7x (64 MiB physical VMEM) while
    # still allowing bigger tiles on v5e/v6e (128 MiB physical).
    need = (2 * TQ * TK            # adj int8, double-buffered
            + 2 * TQ * OUTP * 4    # out block, double-buffered
            + wh_in_bytes
            + 4 * 1024 * 1024)     # wh1/wh2r/scratch + slack
    vmem_limit2 = int(min(max(32 * 1024 * 1024, need), 48 * 1024 * 1024))

    out_p = pl.pallas_call(
        functools.partial(_attn_kernel, alpha=float(alpha), concat=bool(concat),
                          tk=TK, wh_resident=wh_resident),
        grid_spec=pltpu.PrefetchScalarGridSpec(
            num_scalar_prefetch=0,
            grid=(NP // TQ, NP // TK),
            in_specs=[
                pl.BlockSpec((TQ, 1), lambda qi, ki: (qi, 0)),    # Wh1 (rows)
                pl.BlockSpec((1, TK), lambda qi, ki: (0, ki)),    # Wh2 row (cols)
                wh_spec,                                          # Wh (keys)
                pl.BlockSpec((TQ, TK), lambda qi, ki: (qi, ki)),  # adj int8 tile
            ],
            out_specs=pl.BlockSpec((TQ, OUTP), lambda qi, ki: (qi, 0)),
            scratch_shapes=[
                pltpu.VMEM((TQ, 1), jnp.float32),     # running max
                pltpu.VMEM((TQ, 1), jnp.float32),     # running sum
            ],
        ),
        out_shape=jax.ShapeDtypeStruct((NP, OUTP), f32),
        compiler_params=pltpu.CompilerParams(
            dimension_semantics=("parallel", "arbitrary"),
            vmem_limit_bytes=vmem_limit2,
        ),
    )(wh1, wh2_row, wh, adj_p)

    return out_p[:N, :out_size].astype(h.dtype)


# ----------------------------------------------------------------------------
# Reference + test harness
# ----------------------------------------------------------------------------
def _xavier_uniform(key, shape, gain):
    fan_in, fan_out = shape[0], shape[1]
    bound = gain * np.sqrt(6.0 / (fan_in + fan_out))
    return jax.random.uniform(key, shape, jnp.float32, minval=-bound, maxval=bound)


def _reference(h, adj, W, a, alpha, concat):
    out_size = W.shape[1]
    Wh = h @ W
    e = Wh @ a[:out_size] + (Wh @ a[out_size:]).T
    e = jnp.where(e > 0, e, alpha * e)
    att = jnp.where(adj > 0, e, jnp.full_like(e, -9.0e15))
    att = jax.nn.softmax(att, axis=1)
    hp = att @ Wh
    return jnp.maximum(hp, 0.0) if concat else hp


if __name__ == "__main__":
    # Small but multi-tile shapes (non-multiples of 128 to exercise padding):
    N, in_size, out_size = 200, 48, 40
    alpha = 0.2
    concat = True

    key = jax.random.PRNGKey(0)
    k_h, k_adj, k_w, k_a = jax.random.split(key, 4)

    h = jax.random.normal(k_h, (N, in_size), jnp.float32)
    # Sparse 0/1 adjacency with self-loops (every row has >= 1 neighbor).
    adj = (jax.random.uniform(k_adj, (N, N)) > 0.9).astype(jnp.float32)
    adj = jnp.maximum(adj, jnp.eye(N, dtype=jnp.float32))

    # Parameter init (shapes from __init__): W (in, out), a (2*out, 1).
    W = _xavier_uniform(k_w, (in_size, out_size), gain=1.414)
    a = _xavier_uniform(k_a, (2 * out_size, 1), gain=1.414)

    out = graph_attention_layer(h, adj, W, a, alpha=alpha, concat=concat)
    out = jax.block_until_ready(out)

    ref = _reference(h, adj, W, a, alpha, concat)
    np.testing.assert_allclose(np.asarray(out), np.asarray(ref), rtol=5e-4, atol=5e-4)

    print("KERNEL_OK")
</pallas_src>

<mosaic_0001>
module attributes {stable_mosaic.version = 11 : i64} {
  func.func @_project_kernel(%arg0: i32, %arg1: memref<128x128xf32, #tpu.memory_space<vmem>>, %arg2: memref<128x128xf32, #tpu.memory_space<vmem>>, %arg3: memref<1x128xf32, #tpu.memory_space<vmem>>, %arg4: memref<1x128xf32, #tpu.memory_space<vmem>>, %arg5: memref<128x128xf32, #tpu.memory_space<vmem>>, %arg6: memref<128x2xf32, #tpu.memory_space<vmem>>) attributes {dimension_semantics = [#tpu.dimension_semantics<parallel>], iteration_bounds = array<i64: 2>, scalar_prefetch = 0 : i64, scratch_operands = 0 : i64, tpu.core_type = #tpu.core_type<tc>, window_params = [{transform_indices = @transform_0, window_bounds = array<i64: 128, 128>}, {pipeline_mode = #tpu.pipeline_mode<synchronous>, transform_indices = @transform_1, window_bounds = array<i64: 128, 128>}, {pipeline_mode = #tpu.pipeline_mode<synchronous>, transform_indices = @transform_2, window_bounds = array<i64: 1, 128>}, {pipeline_mode = #tpu.pipeline_mode<synchronous>, transform_indices = @transform_3, window_bounds = array<i64: 1, 128>}, {transform_indices = @transform_4, window_bounds = array<i64: 128, 128>}, {transform_indices = @transform_5, window_bounds = array<i64: 128, 2>}]} {
    %c0 = arith.constant 0 : index
    %c0_0 = arith.constant 0 : index
    %0 = vector.load %arg1[%c0, %c0_0] : memref<128x128xf32, #tpu.memory_space<vmem>>, vector<128x128xf32>
    %c0_1 = arith.constant 0 : index
    %c0_2 = arith.constant 0 : index
    %1 = vector.load %arg2[%c0_1, %c0_2] : memref<128x128xf32, #tpu.memory_space<vmem>>, vector<128x128xf32>
    %cst = arith.constant dense<0.000000e+00> : vector<128x128xf32>
    %2 = tpu.matmul %0, %1, %cst {dimension_numbers = #tpu.dot_dimension_numbers<[1], [0], [0], [1], [0, 0, 1, 1], [], []>} : vector<128x128xf32>, vector<128x128xf32>, vector<128x128xf32> -> vector<128x128xf32>
    %c0_3 = arith.constant 0 : index
    %c0_4 = arith.constant 0 : index
    %3 = vector.load %arg5[%c0_3, %c0_4] : memref<128x128xf32, #tpu.memory_space<vmem>>, vector<128x128xf32>
    tpu.vector_store %arg5[%c0_3, %c0_4], %2 {strides = array<i32>} : memref<128x128xf32, #tpu.memory_space<vmem>>, vector<128x128xf32>,
    %c0_5 = arith.constant 0 : index
    %c0_6 = arith.constant 0 : index
    %4 = vector.load %arg3[%c0_5, %c0_6] : memref<1x128xf32, #tpu.memory_space<vmem>>, vector<1x128xf32>
    %5 = vector.broadcast %4 : vector<1x128xf32> to vector<128x128xf32>
    %6 = arith.mulf %2, %5 : vector<128x128xf32>
    %cst_7 = arith.constant dense<0.000000e+00> : vector<128xf32>
    %7 = vector.multi_reduction <add>, %6, %cst_7 [1] : vector<128x128xf32> to vector<128xf32>
    %8 = vector.shape_cast %7 : vector<128xf32> to vector<128x1xf32>
    %c0_8 = arith.constant 0 : index
    %c0_9 = arith.constant 0 : index
    %9 = vector.load %arg6[%c0_8, %c0_9] : memref<128x2xf32, #tpu.memory_space<vmem>>, vector<128x1xf32>
    tpu.vector_store %arg6[%c0_8, %c0_9], %8 {strides = array<i32>} : memref<128x2xf32, #tpu.memory_space<vmem>>, vector<128x1xf32>,
    %c0_10 = arith.constant 0 : index
    %c0_11 = arith.constant 0 : index
    %10 = vector.load %arg4[%c0_10, %c0_11] : memref<1x128xf32, #tpu.memory_space<vmem>>, vector<1x128xf32>
    %11 = vector.broadcast %10 : vector<1x128xf32> to vector<128x128xf32>
    %12 = arith.mulf %2, %11 : vector<128x128xf32>
    %cst_12 = arith.constant dense<0.000000e+00> : vector<128xf32>
    %13 = vector.multi_reduction <add>, %12, %cst_12 [1] : vector<128x128xf32> to vector<128xf32>
    %14 = vector.shape_cast %13 : vector<128xf32> to vector<128x1xf32>
    %c0_13 = arith.constant 0 : index
    %c1 = arith.constant 1 : index
    %15 = vector.load %arg6[%c0_13, %c1] : memref<128x2xf32, #tpu.memory_space<vmem>>, vector<128x1xf32>
    tpu.vector_store %arg6[%c0_13, %c1], %14 {strides = array<i32>} : memref<128x2xf32, #tpu.memory_space<vmem>>, vector<128x1xf32>,
    return
  }
  func.func @transform_0(%arg0: i32) -> (i32, i32) {
    %c0_i32 = arith.constant 0 : i32
    %c0_i32_0 = arith.constant 0 : i32
    return %arg0, %c0_i32 : i32, i32
  }
  func.func @transform_1(%arg0: i32) -> (i32, i32) {
    %c0_i32 = arith.constant 0 : i32
    %c0_i32_0 = arith.constant 0 : i32
    %c0_i32_1 = arith.constant 0 : i32
    return %c0_i32, %c0_i32_0 : i32, i32
  }
  func.func @transform_2(%arg0: i32) -> (i32, i32) {
    %c0_i32 = arith.constant 0 : i32
    %c0_i32_0 = arith.constant 0 : i32
    %c0_i32_1 = arith.constant 0 : i32
    return %c0_i32, %c0_i32_0 : i32, i32
  }
  func.func @transform_3(%arg0: i32) -> (i32, i32) {
    %c0_i32 = arith.constant 0 : i32
    %c0_i32_0 = arith.constant 0 : i32
    %c0_i32_1 = arith.constant 0 : i32
    return %c0_i32, %c0_i32_0 : i32, i32
  }
  func.func @transform_4(%arg0: i32) -> (i32, i32) {
    %c0_i32 = arith.constant 0 : i32
    %c0_i32_0 = arith.constant 0 : i32
    return %arg0, %c0_i32 : i32, i32
  }
  func.func @transform_5(%arg0: i32) -> (i32, i32) {
    %c0_i32 = arith.constant 0 : i32
    %c0_i32_0 = arith.constant 0 : i32
    return %arg0, %c0_i32 : i32, i32
  }
}

</mosaic_0001>

<bundles_post_ra>
// kernel: tpu_custom_call.1
= control target key start
LH: loop header
LB: loop body
LE: loop exit
PB: predicated region body
PF: predicated region fallthrough
CT: control target
= control target key end

     0   :  { %11 = vsyncpa [#allocation3], 0  ;;  %s1488_s0 = inlined_call_operand.hbm [shape: f32[256,128], index: 0, kind: input, shape index: {}]   ;;  %s1489_s1 = inlined_call_operand.hbm [shape: f32[128,128], index: 1, kind: input, shape index: {}]   ;;  %s1490_s2 = inlined_call_operand.vmem [shape: f32[1,128], index: 2, kind: input, shape index: {}]   ;;  %s1491_s3 = inlined_call_operand.vmem [shape: f32[1,128], index: 3, kind: input, shape index: {}]   ;;  %s1492_s4 = inlined_call_operand.hbm [shape: f32[256,128], index: 4, kind: output, shape index: {0}]   ;;  %s1493_s5 = inlined_call_operand.vmem [shape: f32[256,2], index: 5, kind: output, shape index: {1}]  }
   0x1   :  { %13 = vsyncpa [#allocation3 + $0x1], 0 }
   0x2   :  { %14 = vsyncpa [#allocation6], 0 }
   0x3   :  { %15 = vsyncpa [#allocation4], 0 }
   0x4   :  { %17 = vsyncpa [#allocation4 + $0x1], 0  ;;  %s1128_s18 = smov 0   ;;  %s1130_s19 = smov 0  }
   0x5   :  { %s1132_s20 = smov 0   ;;  %s1134_s21 = smov 0  }
   0x6 LB: > { %s1149_s22 = sadd.s32 4294967295, %s1089_s21   ;;  %s742_s23 = sadd.s32 4294967294, %s1089_s21   ;;  %s1089_s21 = sphi %s1134_s21, %s1513_s21   ;;  %s1085_s20 = sphi %s1132_s20, %s1512_s20   ;;  %s1081_s19 = sphi %s1130_s19, %s1511_s19   ;;  %s1077_s18 = sphi %s1128_s18, %s1510_s18  }
   0x7   : > { %p43_p0 = scmp.ne.s32.totalorder %s1081_s19, %s1077_s18  ;;  %p1494_p1 = scmp.eq.s32.totalorder %s1149_s22, 0 }
   0x8   : > { %p136_p3 = scmp.eq.s32.totalorder %s742_s23, 1  ;;  %p743_p5 = scmp.ge.s32.totalorder %s1089_s21, 1 }
   0x9   : > { %p1158_p4 = por %p1494_p1, %p43_p0  ;;  %p169_p7 = scmp.lt.s32.totalorder %s1089_s21, 3 }
   0xa   : > { %p1163_p6 = por %p136_p3, %p43_p0  ;;  %s1091_s27 = smov [#allocation5]  }
   0xb   : > { %s1497_s24 = scalar_select %p1158_p4, 1, 0 }
   0xc   : > { %s1498_s25 = scalar_select %p1163_p6, 1, 0 }
   0xd   : > { %p1168_p8 = pnand %p743_p5, %p169_p7  ;;  %s181_s28 = sshll.u32 %s1091_s27, 4  ;;  %s1172_s28 = int_to_ptr.vmem [resolvable:$true] %s181_s28 }
   0xe   : > { %s1184_s30 = sadd.s32 1, %s1089_s21   ;;  %s30_s6 = sadd.s32 1, %s1085_s20 }
   0xf   : > { %s1499_s26 = scalar_select %p1168_p8, 1, 0 }
  0x10   : > { %p908_p9 = pneg %p1168_p8  ;;  %s27_s7 = ssub.s32 %s1089_s21, %s1184_s30 }
  0x11   : > { %s961_s10 = scalar_lea.hbm %s1489_s1, 2048 }
  0x12   : > { %p1179_p11 = pnand %p908_p9, %p1494_p1  ;;  %p962_p12 = scmp.ne.s32.totalorder %s1489_s1, %s961_s10 }
  0x13   : > { %p968_p5 = scmp.lt.u32.totalorder %s961_s10, %s1489_s1 }
  0x14   : > { %p963_p13 = pneg %p1179_p11 }
  0x16   : > { %p964_p0 = pnand %p963_p13, %p962_p12 }
  0x18   : > { %p965_p3 = pneg %p964_p0 }
  0x1a   : > { %p970_p7 = pnand %p968_p5, %p965_p3 }
  0x1c   : > { %973 = shalt.err (!%p970_p7)
}
  0x1d   : > { %s974_s15 = scalar_lea.vmem %s1172_s28, 2048  ;;  %p982_p2 = scmp.lt.s32.totalorder %s1172_s28, %s1172_s28 }
  0x1e   : > { %p975_p9 = scmp.ne.s32.totalorder %s1172_s28, %s974_s15  ;;  %p983_p6 = scmp.lt.s32.totalorder %s974_s15, %s974_s15 }
  0x20   : > { %p977_p10 = pnand %p975_p9, %p963_p13  ;;  %p984_p4 = por %p983_p6, %p982_p2 }
  0x22   : > { %p978_p1 = pneg %p977_p10 }
  0x24   : > { %p985_p8 = pnand %p984_p4, %p978_p1 }
  0x26   : > { %988 = shalt.err (!%p985_p8)
}
  0x27   : > { %s1092_s16 = smov 128   ;;  %s1093_s17 = smov 8  }
  0x28   : > { %911 = dma.hbm_to_vmem [thread:$0]  (!%p1179_p11), %s1489_s1, 2048, %s1172_s28, [#allocation6], %s1092_s16, %s1092_s16, %s1093_s17  }
  0x29   : > { %p28_p1 = scmp.eq.s32.totalorder %s27_s7, 0  ;;  %p37_p2 = scmp.ne.s32.totalorder %s1085_s20, %s1081_s19 }
  0x2a   : > { %p38_p4 = scmp.eq.s32.totalorder %s1089_s21, 0  ;;  %p921_p6 = scmp.lt.s32.totalorder %s1089_s21, 2 }
  0x2b   : > { %s1218_s8 = scalar_select %p28_p1, %s1085_s20, %s30_s6  }
  0x2c   : > { %p39_p8 = por %p38_p4, %p37_p2  ;;  %p1501_p10 = scmp.eq.s32.totalorder %s1149_s22, 1 }
  0x2d   : > { %s201_s29 = sand.u32 1, %s1085_s20   ;;  %s762_s10 = sshll.u32 %s1089_s21, 11 }
  0x2e   : > { %p1222_p12 = por %p1501_p10, %p37_p2  ;;  %s746_s11 = sshll.u32 %s201_s29, 7 }
  0x2f   : > { %s1231_s14 = scalar_lea.hbm %s1488_s0, %s762_s10  ;;  %s205_s28 = scalar_lea.vmem [#allocation2], %s746_s11 }
  0x30   : > { %s212_s6 = sshll.u32 %s205_s28, 4  ;;  %p1233_p11 = pnand %p921_p6, %p39_p8  ;;  %s1237_s6 = int_to_ptr.vmem [resolvable:$true] %s212_s6 }
  0x31   : > { %s1239_s15 = scalar_lea.sflag [#allocation3], %s201_s29  ;;  %s989_s23 = scalar_lea.hbm %s1231_s14, 2048 }
  0x32   : > { %p990_p13 = scmp.ne.s32.totalorder %s1231_s14, %s989_s23  ;;  %p991_p0 = pneg %p1233_p11 }
  0x33   : > { %s994_s11 = scalar_lea.hbm %s1488_s0, 4096  ;;  %p995_p7 = scmp.lt.u32.totalorder %s1231_s14, %s1488_s0 }
  0x34   : > { %p992_p3 = pnand %p991_p0, %p990_p13  ;;  %p996_p9 = scmp.lt.u32.totalorder %s994_s11, %s989_s23 }
  0x35   : > { %p998_p2 = scmp.lt.u32.totalorder %s989_s23, %s1231_s14 }
  0x36   : > { %p993_p5 = pneg %p992_p3  ;;  %p997_p1 = por %p996_p9, %p995_p7 }
  0x38   : > { %p999_p4 = por %p998_p2, %p997_p1 }
  0x3a   : > { %p1000_p6 = pnand %p999_p4, %p993_p5 }
  0x3c   : > { %1003 = shalt.err (!%p1000_p6)
}
  0x3d   : > { %s1004_s29 = scalar_lea.vmem %s1237_s6, 2048  ;;  %s1094_s28 = smov [#allocation2]  }
  0x3e   : > { %p1005_p8 = scmp.ne.s32.totalorder %s1237_s6, %s1004_s29  ;;  %s1009_s27 = sshll.u32 %s1094_s28, 4  ;;  %s1010_s27 = int_to_ptr.vmem [resolvable:$false] %s1009_s27 }
  0x3f   : > { %s1011_s10 = scalar_lea.vmem %s1010_s27, 4096  ;;  %p1012_p3 = scmp.lt.s32.totalorder %s1237_s6, %s1010_s27 }
  0x40   : > { %p1007_p10 = pnand %p1005_p8, %p991_p0  ;;  %p1013_p7 = scmp.lt.s32.totalorder %s1011_s10, %s1004_s29 }
  0x42   : > { %p1008_p13 = pneg %p1007_p10  ;;  %p1014_p9 = por %p1013_p7, %p1012_p3 }
  0x44   : > { %p1015_p1 = pnand %p1014_p9, %p1008_p13 }
  0x46   : > { %1018 = shalt.err (!%p1015_p1)
}
  0x47   : > { %915 = dma.hbm_to_vmem [thread:$0]  (!%p1233_p11), %s1231_s14, 2048, %s1237_s6, %s1239_s15, %s1092_s16, %s1092_s16, %s1093_s17  }
  0x48   : > { %p1504_p0 = scmp.ne.s32.totalorder %s1499_s26, 0 }
  0x49   : > { %s1273_s23 = sand.u32 (!%p1504_p0), 1, %s1081_s19   ;;  %p1505_p5 = scmp.ne.s32.totalorder (!%p1504_p0), %s1497_s24, 0 }
  0x4a   : > { %224 = sbr.rel (%p1504_p0) target bundleno = 537 (0x219), region = 36  ;;  %s750_s11 = sshll.u32 (!%p1504_p0), %s1273_s23, 7 }
  0x4b   : > { %s227_s12 = scalar_lea.sflag (!%p1504_p0), [#allocation3], %s1273_s23  ;;  %s1279_s7 = scalar_lea.vmem (!%p1504_p0), [#allocation2], %s750_s11 }
  0x51   : > { %1064 = dma.done.wait (%p1505_p5), %s227_s12, 2048  }
  0x52   : > { %1066 = vsyncadd (%p1505_p5), %s227_s12, 4294965248  ;;  %p1506_p11 = scmp.eq.s32.totalorder %s1149_s22, 0 }
  0x54   : > { %1068 = dma.done.wait (%p1506_p11), [#allocation6], 2048   ;;  %p1507_p2 = pmov %p1506_p11 }
  0x55   : > { %v290_v0 = vld [vmem:[#allocation5] sm:$0xff]  ;;  %v291_v1 = vld [vmem:[#allocation5 + $0x8] sm:$0xff]  ;;  %v292_v2 = vld [vmem:[#allocation5 + $0x10] sm:$0xff]  ;;  %s1312_s16 = scalar_lea.vmem [#allocation7], %s750_s11  ;;  %s763_s6 = sshll.u32 %s1149_s22, 11 }
  0x56   : > { %1070 = vsyncadd (%p1507_p2), [#allocation6], 4294965248  ;;  %v852_v3 = vpack.c.bf16 %v291_v1, %v290_v0  ;;  %v293_v4 = vld [vmem:[#allocation5 + $0x18] sm:$0xff]  ;;  %v294_v6 = vld [vmem:[#allocation5 + $0x20] sm:$0xff]  ;;  %s630_s15 = sshll.u32 %s1312_s16, 4  ;;  %s1372_s28 = scalar_lea.hbm %s1492_s4, %s763_s6  ;;  %s1374_s15 = int_to_ptr.vmem [resolvable:$true] %s630_s15 }
  0x57   : > { %v856_v5 = vpack.c.bf16 %v293_v4, %v292_v2  ;;  %v295_v7 = vld [vmem:[#allocation5 + $0x28] sm:$0xff]  ;;  %v274_v9 = vld [vmem:[%s1279_s7] sm:$0xff]  ;;  %v296_v11 = vld [vmem:[#allocation5 + $0x30] sm:$0xff]  ;;  %s612_s27 = scalar_lea.sflag [#allocation4], %s1273_s23  ;;  %s1019_s10 = scalar_lea.vmem %s1374_s15, 2048 }
  0x58   : > { %853 = vmatprep.subr.bf16.mxu0 %v852_v3  ;;  %884 = vmatprep.subr.bf16.mxu1 %v852_v3  ;;  %v860_v8 = vpack.c.bf16 %v295_v7, %v294_v6  ;;  %v282_v10 = vld [vmem:[%s1279_s7 + $0x40] sm:$0xff]  ;;  %v297_v12 = vld [vmem:[#allocation5 + $0x38] sm:$0xff]  ;;  %v299_v15 = vld [vmem:[#allocation5 + $0x48] sm:$0xff]  ;;  %p1020_p4 = scmp.ne.s32.totalorder %s1374_s15, %s1019_s10  ;;  %s1095_s11 = smov [#allocation7]  }
  0x59   : > { %855 = vmatpush3.bf16.msra.mxu0 %v852_v3  ;;  %892 = vmatpush3.bf16.msra.mxu1 %v852_v3  ;;  %v864_v13 = vpack.c.bf16 %v297_v12, %v296_v11  ;;  %v298_v14 = vld [vmem:[#allocation5 + $0x40] sm:$0xff]  ;;  %v300_v17 = vld [vmem:[#allocation5 + $0x50] sm:$0xff]  ;;  %v301_v18 = vld [vmem:[#allocation5 + $0x58] sm:$0xff]  ;;  %s1023_s12 = sshll.u32 %s1095_s11, 4  ;;  %s1024_s12 = int_to_ptr.vmem [resolvable:$false] %s1023_s12 }
  0x5a   : > { %857 = vmatprep.subr.bf16.mxu0 %v856_v5  ;;  %885 = vmatprep.subr.bf16.mxu1 %v856_v5  ;;  %v868_v16 = vpack.c.bf16 %v299_v15, %v298_v14  ;;  %v872_v19 = vpack.c.bf16 %v301_v18, %v300_v17  ;;  %v302_v20 = vld [vmem:[#allocation5 + $0x60] sm:$0xff]  ;;  %v303_v21 = vld [vmem:[#allocation5 + $0x68] sm:$0xff]  ;;  %v304_v23 = vld [vmem:[#allocation5 + $0x70] sm:$0xff]  ;;  %p1021_p6 = pnand %p1020_p4, %p1222_p12  ;;  %p1026_p10 = scmp.lt.s32.totalorder %s1374_s15, %s1024_s12 }
  0x5b   : > { %828 = vmatprep.mubr.f32.mxu0 %v274_v9  ;;  %840 = vmatprep.mubr.f32.mxu1 %v282_v10  ;;  %v876_v22 = vpack.c.bf16 %v303_v21, %v302_v20  ;;  %v305_v24 = vld [vmem:[#allocation5 + $0x78] sm:$0xff]  ;;  %v275_v26 = vld [vmem:[%s1279_s7 + $0x8] sm:$0xff]  ;;  %v276_v28 = vld [vmem:[%s1279_s7 + $0x10] sm:$0xff] }
  0x5c   : > { %v880_v25 = vpack.c.bf16 %v305_v24, %v304_v23  ;;  %v283_v27 = vld [vmem:[%s1279_s7 + $0x48] sm:$0xff]  ;;  %v284_v29 = vld [vmem:[%s1279_s7 + $0x50] sm:$0xff]  ;;  %v277_v30 = vld [vmem:[%s1279_s7 + $0x18] sm:$0xff]  ;;  %p1022_p8 = pneg %p1021_p6 }
  0x5d   : > { %859 = vmatpush3.bf16.msra.mxu0 %v856_v5  ;;  %893 = vmatpush3.bf16.msra.mxu1 %v856_v5  ;;  %v285_v31 = vld [vmem:[%s1279_s7 + $0x58] sm:$0xff]  ;;  %v278_v32 = vld [vmem:[%s1279_s7 + $0x20] sm:$0xff]  ;;  %v279_v34 = vld [vmem:[%s1279_s7 + $0x28] sm:$0xff] }
  0x5e   : > { %861 = vmatprep.subr.bf16.mxu0 %v860_v8  ;;  %886 = vmatprep.subr.bf16.mxu1 %v860_v8  ;;  %v286_v33 = vld [vmem:[%s1279_s7 + $0x60] sm:$0xff]  ;;  %v287_v35 = vld [vmem:[%s1279_s7 + $0x68] sm:$0xff]  ;;  %v280_v36 = vld [vmem:[%s1279_s7 + $0x30] sm:$0xff] }
  0x5f   : > { %v288_v37 = vld [vmem:[%s1279_s7 + $0x70] sm:$0xff]  ;;  %v281_v38 = vld [vmem:[%s1279_s7 + $0x38] sm:$0xff]  ;;  %v1308_v40 = vld [vmem:[%s1490_s2] ss:$0 sm:$0xff] }
  0x60   : > { %v289_v39 = vld [vmem:[%s1279_s7 + $0x78] sm:$0xff]  ;;  %v1323_v47 = vld [vmem:[%s1491_s3] ss:$0 sm:$0xff]  ;;  %s1025_s7 = scalar_lea.vmem %s1024_s12, 4096 }
  0x61   : > { %863 = vmatpush3.bf16.msra.mxu0 %v860_v8  ;;  %894 = vmatpush3.bf16.msra.mxu1 %v860_v8  ;;  %p1027_p13 = scmp.lt.s32.totalorder %s1025_s7, %s1019_s10 }
  0x62   : > { %865 = vmatprep.subr.bf16.mxu0 %v864_v13  ;;  %887 = vmatprep.subr.bf16.mxu1 %v864_v13 }
  0x63   : > { %p1028_p3 = por %p1027_p13, %p1026_p10 }
  0x65   : > { %867 = vmatpush3.bf16.msra.mxu0 %v864_v13  ;;  %895 = vmatpush3.bf16.msra.mxu1 %v864_v13  ;;  %p1029_p7 = pnand %p1028_p3, %p1022_p8 }
  0x66   : > { %869 = vmatprep.subr.bf16.mxu0 %v868_v16  ;;  %888 = vmatprep.subr.bf16.mxu1 %v868_v16 }
  0x69   : > { %871 = vmatpush3.bf16.msra.mxu0 %v868_v16  ;;  %896 = vmatpush3.bf16.msra.mxu1 %v868_v16 }
  0x6a   : > { %873 = vmatprep.subr.bf16.mxu0 %v872_v19  ;;  %889 = vmatprep.subr.bf16.mxu1 %v872_v19 }
  0x6d   : > { %875 = vmatpush3.bf16.msra.mxu0 %v872_v19  ;;  %897 = vmatpush3.bf16.msra.mxu1 %v872_v19 }
  0x6e   : > { %877 = vmatprep.subr.bf16.mxu0 %v876_v22  ;;  %890 = vmatprep.subr.bf16.mxu1 %v876_v22 }
  0x71   : > { %879 = vmatpush3.bf16.msra.mxu0 %v876_v22  ;;  %898 = vmatpush3.bf16.msra.mxu1 %v876_v22 }
  0x72   : > { %881 = vmatprep.subr.bf16.mxu0 %v880_v25  ;;  %891 = vmatprep.subr.bf16.mxu1 %v880_v25 }
  0x75   : > { %883 = vmatpush3.bf16.msra.mxu0 %v880_v25  ;;  %899 = vmatpush3.bf16.msra.mxu1 %v880_v25 }
  0x78   : > { %829 = vmatmul.mubr.f32.vlgmr.msra.gmra.mrb[0].mxu0 %v275_v26  ;;  %841 = vmatmul.mubr.f32.vlgmr.msra.gmra.mrb[0].mxu1 %v283_v27 }
  0x79   : > { %831 = vmatprep.mubr.f32.mxu0 %v276_v28  ;;  %843 = vmatprep.mubr.f32.mxu1 %v284_v29 }
  0x7c   : > { %832 = vmatmul.mubr.f32.gmra.mrb[2].mxu0 %v277_v30  ;;  %844 = vmatmul.mubr.f32.gmra.mrb[2].mxu1 %v285_v31 }
  0x7d   : > { %834 = vmatprep.mubr.f32.mxu0 %v278_v32  ;;  %846 = vmatprep.mubr.f32.mxu1 %v286_v33 }
  0x80   : > { %835 = vmatmul.mubr.f32.gmra.mrb[4].mxu0 %v279_v34  ;;  %847 = vmatmul.mubr.f32.gmra.mrb[4].mxu1 %v287_v35 }
  0x81   : > { %837 = vmatprep.mubr.f32.mxu0 %v280_v36  ;;  %849 = vmatprep.mubr.f32.mxu1 %v288_v37 }
  0x84   : > { %838 = vmatmul.mubr.f32.gmra.mrb[6].mxu0 %v281_v38  ;;  %850 = vmatmul.mubr.f32.gmra.mrb[6].mxu1 %v289_v39 }
 0x14b   : > { %v830_v41 = vpop.f32.mrb[0].mxu0  ;;  %v842_v42 = vpop.f32.mrb[0].mxu1 }
 0x14c   : > { %452 = vst [vmem:[%s1312_s16 + $0x8] sm:$0xff] %v830_v41  ;;  %460 = vst [vmem:[%s1312_s16 + $0x48] sm:$0xff] %v842_v42  ;;  %v372_v43 = vpop.f32.mrb[1].mxu0  ;;  %v412_v44 = vpop.f32.mrb[1].mxu1  ;;  %v483_v45 = vmul.f32 %v842_v42, %v1308_v40  ;;  %v475_v46 = vmul.f32 %v830_v41, %v1308_v40  ;;  %v547_v50 = vmul.f32 %v830_v41, %v1323_v47 }
 0x14d   : > { %451 = vst [vmem:[%s1312_s16] sm:$0xff] %v372_v43  ;;  %459 = vst [vmem:[%s1312_s16 + $0x40] sm:$0xff] %v412_v44  ;;  %v474_v51 = vmul.f32 %v1308_v40, %v372_v43  ;;  %v555_v56 = vmul.f32 %v842_v42, %v1323_v47  ;;  %v482_v57 = vmul.f32 %v1308_v40, %v412_v44 }
 0x14e   : > { %508 = vadd.xlane.f32.xlu1 %v483_v45  ;;  %492 = vadd.xlane.f32.xlu0 %v475_v46  ;;  %v546_v63 = vmul.f32 %v1323_v47, %v372_v43  ;;  %v554_v3 = vmul.f32 %v1323_v47, %v412_v44 }
 0x14f   : > { %v833_v48 = vpop.f32.mrb[2].mxu0  ;;  %v845_v49 = vpop.f32.mrb[2].mxu1 }
 0x150   : > { %454 = vst [vmem:[%s1312_s16 + $0x18] sm:$0xff] %v833_v48  ;;  %v382_v52 = vpop.f32.mrb[3].mxu0  ;;  %462 = vst [vmem:[%s1312_s16 + $0x58] sm:$0xff] %v845_v49  ;;  %v422_v53 = vpop.f32.mrb[3].mxu1  ;;  %v477_v60 = vmul.f32 %v833_v48, %v1308_v40  ;;  %v485_v2 = vmul.f32 %v845_v49, %v1308_v40  ;;  %v549_v5 = vmul.f32 %v833_v48, %v1323_v47 }
 0x151   : > { %453 = vst [vmem:[%s1312_s16 + $0x10] sm:$0xff] %v382_v52  ;;  %461 = vst [vmem:[%s1312_s16 + $0x50] sm:$0xff] %v422_v53  ;;  %v484_v4 = vmul.f32 %v1308_v40, %v422_v53  ;;  %v557_v6 = vmul.f32 %v845_v49, %v1323_v47  ;;  %v548_v7 = vmul.f32 %v1323_v47, %v382_v52 }
 0x152   : > { %564 = vadd.xlane.f32.xlu1 %v547_v50  ;;  %490 = vadd.xlane.f32.xlu0 %v474_v51  ;;  %v556_v8 = vmul.f32 %v1323_v47, %v422_v53  ;;  %v476_v9 = vmul.f32 %v1308_v40, %v382_v52 }
 0x153   : > { %v836_v54 = vpop.f32.mrb[4].mxu0  ;;  %v848_v55 = vpop.f32.mrb[4].mxu1 }
 0x154   : > { %456 = vst [vmem:[%s1312_s16 + $0x28] sm:$0xff] %v836_v54  ;;  %v392_v58 = vpop.f32.mrb[5].mxu0  ;;  %464 = vst [vmem:[%s1312_s16 + $0x68] sm:$0xff] %v848_v55  ;;  %v432_v59 = vpop.f32.mrb[5].mxu1  ;;  %v479_v10 = vmul.f32 %v836_v54, %v1308_v40  ;;  %v487_v12 = vmul.f32 %v848_v55, %v1308_v40  ;;  %v551_v14 = vmul.f32 %v836_v54, %v1323_v47 }
 0x155   : > { %455 = vst [vmem:[%s1312_s16 + $0x20] sm:$0xff] %v392_v58  ;;  %463 = vst [vmem:[%s1312_s16 + $0x60] sm:$0xff] %v432_v59  ;;  %v478_v11 = vmul.f32 %v1308_v40, %v392_v58  ;;  %v486_v13 = vmul.f32 %v1308_v40, %v432_v59  ;;  %v550_v15 = vmul.f32 %v1323_v47, %v392_v58 }
 0x156   : > { %580 = vadd.xlane.f32.xlu1 %v555_v56  ;;  %506 = vadd.xlane.f32.xlu0 %v482_v57  ;;  %v559_v16 = vmul.f32 %v848_v55, %v1323_v47  ;;  %v558_v17 = vmul.f32 %v1323_v47, %v432_v59 }
 0x157   : > { %v839_v61 = vpop.f32.mrb[6].mxu0  ;;  %v851_v62 = vpop.f32.mrb[6].mxu1 }
 0x158   : > { %458 = vst [vmem:[%s1312_s16 + $0x38] sm:$0xff] %v839_v61  ;;  %v402_v0 = vpop.f32.mrb[7].mxu0  ;;  %466 = vst [vmem:[%s1312_s16 + $0x78] sm:$0xff] %v851_v62  ;;  %v442_v1 = vpop.f32.mrb[7].mxu1  ;;  %v481_v18 = vmul.f32 %v839_v61, %v1308_v40  ;;  %v489_v20 = vmul.f32 %v851_v62, %v1308_v40  ;;  %v553_v22 = vmul.f32 %v839_v61, %v1323_v47 }
 0x159   : > { %457 = vst [vmem:[%s1312_s16 + $0x30] sm:$0xff] %v402_v0  ;;  %465 = vst [vmem:[%s1312_s16 + $0x70] sm:$0xff] %v442_v1  ;;  %v480_v19 = vmul.f32 %v1308_v40, %v402_v0  ;;  %v488_v21 = vmul.f32 %v1308_v40, %v442_v1  ;;  %v552_v23 = vmul.f32 %v1323_v47, %v402_v0 }
 0x15a   : > { %562 = vadd.xlane.f32.xlu0 %v546_v63  ;;  %496 = vadd.xlane.f32.xlu1 %v477_v60  ;;  %v561_v24 = vmul.f32 %v851_v62, %v1323_v47  ;;  %v560_v25 = vmul.f32 %v1323_v47, %v442_v1 }
 0x15e   : > { %578 = vadd.xlane.f32.xlu0 %v554_v3  ;;  %512 = vadd.xlane.f32.xlu1 %v485_v2 }
 0x162   : > { %510 = vadd.xlane.f32.xlu0 %v484_v4  ;;  %568 = vadd.xlane.f32.xlu1 %v549_v5 }
 0x166   : > { %584 = vadd.xlane.f32.xlu1 %v557_v6  ;;  %566 = vadd.xlane.f32.xlu0 %v548_v7 }
 0x16a   : > { %582 = vadd.xlane.f32.xlu0 %v556_v8  ;;  %494 = vadd.xlane.f32.xlu1 %v476_v9 }
 0x16e   : > { %500 = vadd.xlane.f32.xlu1 %v479_v10  ;;  %498 = vadd.xlane.f32.xlu0 %v478_v11 }
 0x172   : > { %516 = vadd.xlane.f32.xlu1 %v487_v12  ;;  %514 = vadd.xlane.f32.xlu0 %v486_v13 }
 0x176   : > { %572 = vadd.xlane.f32.xlu1 %v551_v14  ;;  %570 = vadd.xlane.f32.xlu0 %v550_v15 }
 0x17a   : > { %588 = vadd.xlane.f32.xlu1 %v559_v16  ;;  %586 = vadd.xlane.f32.xlu0 %v558_v17 }
 0x17e   : > { %504 = vadd.xlane.f32.xlu1 %v481_v18  ;;  %502 = vadd.xlane.f32.xlu0 %v480_v19 }
 0x182   : > { %520 = vadd.xlane.f32.xlu1 %v489_v20  ;;  %518 = vadd.xlane.f32.xlu0 %v488_v21 }
 0x186   : > { %576 = vadd.xlane.f32.xlu1 %v553_v22  ;;  %574 = vadd.xlane.f32.xlu0 %v552_v23 }
 0x18a   : > { %592 = vadd.xlane.f32.xlu1 %v561_v24  ;;  %590 = vadd.xlane.f32.xlu0 %v560_v25 }
 0x18b   : > { %1032 = shalt.err (!%p1029_p7)
}
 0x18c   : > { %s1033_s24 = scalar_lea.hbm %s1372_s28, 2048  ;;  %s1037_s17 = scalar_lea.hbm %s1492_s4, 4096 }
 0x18d   : > { %p1034_p9 = scmp.ne.s32.totalorder %s1372_s28, %s1033_s24  ;;  %p1038_p5 = scmp.lt.u32.totalorder %s1372_s28, %s1492_s4 }
 0x18e   : > { %p1039_p11 = scmp.lt.u32.totalorder %s1037_s17, %s1033_s24  ;;  %p1041_p4 = scmp.lt.u32.totalorder %s1033_s24, %s1372_s28 }
 0x18f   : > { %p1035_p1 = pnand %p1034_p9, %p1222_p12 }
 0x190   : > { %p1040_p2 = por %p1039_p11, %p1038_p5 }
 0x191   : > { %p1036_p0 = pneg %p1035_p1 }
 0x192   : > { %p1042_p6 = por %p1041_p4, %p1040_p2 }
 0x194   : > { %p1043_p8 = pnand %p1042_p6, %p1036_p0 }
 0x196   : > { %1046 = shalt.err (!%p1043_p8)
}
 0x197   : > { %s1096_s13 = smov 128   ;;  %s1097_s29 = smov 8   ;;  %vm522_vm0 = vcmask 7168   ;;  %vm594_vm1 = vcmask 15368  }
 0x198   : > { %906 = dma.vmem_to_hbm [thread:$0]  (%p1222_p12), %s1374_s15, 2048, %s1372_s28, %s612_s27, %s1096_s13, %s1096_s13, %s1097_s29  }
 0x199   : > { %s753_s10 = sshll.u32 %s1149_s22, 4 }
 0x19a   : > { %p269_p10 = scmp.lt.s32.totalorder %s753_s10, 31 }
 0x19c   : > { %s1515_s10 = smov (!%p269_p10, %s753_s10), 31 }
 0x19d   : > { %s754_s11 = sshll.u32 %s1515_s10, 3 }
 0x19e   : > { %s1404_s24 = scalar_lea.vmem %s1493_s5, %s754_s11 }
 0x1db   : > { %v509_v26 = vpop.xlane.xlu1 %508  ;;  %v493_v27 = vpop.xlane.xlu0 %492 }
 0x1dc   : > { %532 = vst.msk [vmem:[%s1404_s24 + $0x48] sm:$0xff] %vm522_vm0, %v509_v26  ;;  %524 = vst.msk [vmem:[%s1404_s24 + $0x8] sm:$0xff] %vm522_vm0, %v493_v27 }
 0x1df   : > { %v565_v28 = vpop.xlane.xlu1 %564  ;;  %v491_v29 = vpop.xlane.xlu0 %490 }
 0x1e0   : > { %596 = vst.msk [vmem:[%s1404_s24 + $0x8] sm:$0xff] %vm594_vm1, %v565_v28 }
 0x1e1   : > { %523 = vst.msk [vmem:[%s1404_s24] sm:$0xff] %vm522_vm0, %v491_v29 }
 0x1e3   : > { %v581_v30 = vpop.xlane.xlu1 %580  ;;  %v507_v31 = vpop.xlane.xlu0 %506 }
 0x1e4   : > { %604 = vst.msk [vmem:[%s1404_s24 + $0x48] sm:$0xff] %vm594_vm1, %v581_v30 }
 0x1e5   : > { %531 = vst.msk [vmem:[%s1404_s24 + $0x40] sm:$0xff] %vm522_vm0, %v507_v31 }
 0x1e7   : > { %v563_v32 = vpop.xlane.xlu0 %562  ;;  %v497_v33 = vpop.xlane.xlu1 %496 }
 0x1e8   : > { %595 = vst.msk [vmem:[%s1404_s24] sm:$0xff] %vm594_vm1, %v563_v32 }
 0x1e9   : > { %526 = vst.msk [vmem:[%s1404_s24 + $0x18] sm:$0xff] %vm522_vm0, %v497_v33 }
 0x1eb   : > { %v579_v34 = vpop.xlane.xlu0 %578  ;;  %v513_v35 = vpop.xlane.xlu1 %512 }
 0x1ec   : > { %603 = vst.msk [vmem:[%s1404_s24 + $0x40] sm:$0xff] %vm594_vm1, %v579_v34 }
 0x1ed   : > { %534 = vst.msk [vmem:[%s1404_s24 + $0x58] sm:$0xff] %vm522_vm0, %v513_v35 }
 0x1ef   : > { %v511_v36 = vpop.xlane.xlu0 %510  ;;  %v569_v37 = vpop.xlane.xlu1 %568 }
 0x1f0   : > { %533 = vst.msk [vmem:[%s1404_s24 + $0x50] sm:$0xff] %vm522_vm0, %v511_v36 }
 0x1f1   : > { %598 = vst.msk [vmem:[%s1404_s24 + $0x18] sm:$0xff] %vm594_vm1, %v569_v37 }
 0x1f3   : > { %v585_v38 = vpop.xlane.xlu1 %584  ;;  %v567_v39 = vpop.xlane.xlu0 %566 }
 0x1f4   : > { %606 = vst.msk [vmem:[%s1404_s24 + $0x58] sm:$0xff] %vm594_vm1, %v585_v38 }
 0x1f7   : > { %v583_v40 = vpop.xlane.xlu0 %582  ;;  %v495_v41 = vpop.xlane.xlu1 %494 }
 0x1f8   : > { %605 = vst.msk [vmem:[%s1404_s24 + $0x50] sm:$0xff] %vm594_vm1, %v583_v40 }
 0x1f9   : > { %525 = vst.msk [vmem:[%s1404_s24 + $0x10] sm:$0xff] %vm522_vm0, %v495_v41 }
 0x1fa   : > { %597 = vst.msk [vmem:[%s1404_s24 + $0x10] sm:$0xff] %vm594_vm1, %v567_v39 }
 0x1fb   : > { %v501_v42 = vpop.xlane.xlu1 %500  ;;  %v499_v43 = vpop.xlane.xlu0 %498 }
 0x1fc   : > { %528 = vst.msk [vmem:[%s1404_s24 + $0x28] sm:$0xff] %vm522_vm0, %v501_v42  ;;  %527 = vst.msk [vmem:[%s1404_s24 + $0x20] sm:$0xff] %vm522_vm0, %v499_v43 }
 0x1ff   : > { %v517_v44 = vpop.xlane.xlu1 %516  ;;  %v515_v45 = vpop.xlane.xlu0 %514 }
 0x200   : > { %536 = vst.msk [vmem:[%s1404_s24 + $0x68] sm:$0xff] %vm522_vm0, %v517_v44  ;;  %535 = vst.msk [vmem:[%s1404_s24 + $0x60] sm:$0xff] %vm522_vm0, %v515_v45 }
 0x203   : > { %v573_v46 = vpop.xlane.xlu1 %572  ;;  %v571_v47 = vpop.xlane.xlu0 %570 }
 0x204   : > { %600 = vst.msk [vmem:[%s1404_s24 + $0x28] sm:$0xff] %vm594_vm1, %v573_v46  ;;  %599 = vst.msk [vmem:[%s1404_s24 + $0x20] sm:$0xff] %vm594_vm1, %v571_v47 }
 0x207   : > { %v589_v48 = vpop.xlane.xlu1 %588  ;;  %v587_v49 = vpop.xlane.xlu0 %586 }
 0x208   : > { %608 = vst.msk [vmem:[%s1404_s24 + $0x68] sm:$0xff] %vm594_vm1, %v589_v48  ;;  %607 = vst.msk [vmem:[%s1404_s24 + $0x60] sm:$0xff] %vm594_vm1, %v587_v49 }
 0x20b   : > { %v505_v50 = vpop.xlane.xlu1 %504  ;;  %v503_v51 = vpop.xlane.xlu0 %502 }
 0x20c   : > { %530 = vst.msk [vmem:[%s1404_s24 + $0x38] sm:$0xff] %vm522_vm0, %v505_v50  ;;  %529 = vst.msk [vmem:[%s1404_s24 + $0x30] sm:$0xff] %vm522_vm0, %v503_v51 }
 0x20f   : > { %v521_v52 = vpop.xlane.xlu1 %520  ;;  %v519_v53 = vpop.xlane.xlu0 %518 }
 0x210   : > { %538 = vst.msk [vmem:[%s1404_s24 + $0x78] sm:$0xff] %vm522_vm0, %v521_v52  ;;  %537 = vst.msk [vmem:[%s1404_s24 + $0x70] sm:$0xff] %vm522_vm0, %v519_v53 }
 0x213   : > { %v577_v54 = vpop.xlane.xlu1 %576  ;;  %v575_v55 = vpop.xlane.xlu0 %574 }
 0x214   : > { %602 = vst.msk [vmem:[%s1404_s24 + $0x38] sm:$0xff] %vm594_vm1, %v577_v54  ;;  %601 = vst.msk [vmem:[%s1404_s24 + $0x30] sm:$0xff] %vm594_vm1, %v575_v55 }
 0x217   : > { %v593_v56 = vpop.xlane.xlu1 %592  ;;  %v591_v57 = vpop.xlane.xlu0 %590 }
 0x218   : > { %610 = vst.msk [vmem:[%s1404_s24 + $0x78] sm:$0xff] %vm594_vm1, %v593_v56  ;;  %609 = vst.msk [vmem:[%s1404_s24 + $0x70] sm:$0xff] %vm594_vm1, %v591_v57 }
 0x219 PF: > { %s649_s22 = sand.u32 1, %s1077_s18   ;;  %p1508_p12 = scmp.ne.s32.totalorder %s1498_s25, 0 }
 0x21a   : > { %p1509_p13 = scmp.ge.s32.totalorder %s1089_s21, 2  ;;  %s650_s9 = scalar_lea.sflag [#allocation4], %s649_s22 }
 0x21c   : > { %p917_p3 = pnand %p1509_p13, %p1508_p12 }
 0x21e   : > { %1072 = dma.done.wait (!%p917_p3), %s650_s9, 2048  }
 0x21f   : > { %1074 = vsyncadd (!%p917_p3), %s650_s9, 4294965248  ;;  %p20_p7 = scmp.ge.s32.totalorder %s1184_s30, 4   ;;  %s1510_s18 = smov %s1081_s19 }
 0x220   : > { %s1511_s19 = smov %s1085_s20  ;;  %s1512_s20 = smov %s1218_s8 }
 0x221   : > { %s1513_s21 = smov %s1184_s30  ;;  %22 = sbr.rel (!%p20_p7) target bundleno = 6 (0x6), region = 97 }
 0x228   :  { %663 = vsyncpa [#allocation3], 1 }
 0x229   :  { %665 = vsyncpa [#allocation3 + $0x1], 1 }
 0x22a   :  { %666 = vsyncpa [#allocation6], 1 }
 0x22b   :  { %667 = vsyncpa [#allocation4], 1 }
 0x22c   :  { %669 = vsyncpa [#allocation4 + $0x1], 1 }

</bundles_post_ra>
